<compile_context>
chip_gen: v6e
topology: v6e:2x2x1
jax: 0.10.0
libtpu: 0.0.40
codegen_flags: <defaults>
</compile_context>

<pallas_src>
import functools

import jax
import jax.numpy as jnp
from jax.experimental import pallas as pl
from jax.experimental.pallas import tpu as pltpu

GAMMA = 2.0
EPS = 1e-7


def _round_up(x: int, m: int) -> int:
    return ((x + m - 1) // m) * m


def focal_loss_kernel(x_ref, t_ref, w_ref, o_ref, *, n_total: int):
    i = pl.program_id(0)

    @pl.when(i == 0)
    def _init():
        o_ref[...] = jnp.zeros_like(o_ref)

    x = x_ref[...].astype(jnp.float32)      # (TM, C) logits tile (cast in-kernel)
    t = t_ref[...]                          # (TM, 1) int32 targets
    w = w_ref[...].astype(jnp.float32)      # (1, C) per-class weights (resident)
    TM, C = x.shape

    # Row-wise softmax statistics only -- no full softmax / clip / log materialized.
    m = jnp.max(x, axis=1, keepdims=True)           # (TM, 1)
    e = jnp.exp(x - m)                              # (TM, C)  <- only O(N*C) EUP op
    s = jnp.sum(e, axis=1, keepdims=True)           # (TM, 1)

    # One-hot select of the target column; fused mask + reductions.
    cls = jax.lax.broadcasted_iota(jnp.int32, (TM, C), 1)
    mask = cls == t                                 # (TM, C) bool
    et = jnp.sum(jnp.where(mask, e, 0.0), axis=1, keepdims=True)    # exp(x_t - m)
    wt = jnp.sum(jnp.where(mask, w, 0.0), axis=1, keepdims=True)    # weight[t]

    # pt = clamp(softmax(x)[t], eps, 1-eps); log only over (TM, 1) rows.
    pt = jnp.clip(et / s, EPS, 1.0 - EPS)
    lpt = jnp.log(pt)

    one_m_pt = 1.0 - pt
    # nll_loss(reduction='none') -> -w[t] * log p[t]; focal modulation (gamma == 2 -> square).
    loss = -wt * lpt * (one_m_pt * one_m_pt)

    # Mask rows that are padding beyond the true batch size (ragged last tile).
    row = i * TM + jax.lax.broadcasted_iota(jnp.int32, (TM, 1), 0)
    loss = jnp.where(row < n_total, loss, 0.0)

    o_ref[...] += jnp.sum(loss).reshape(1, 1)

    @pl.when(i == pl.num_programs(0) - 1)
    def _finalize():
        # plain mean over the TOTAL number of rows
        o_ref[...] = o_ref[...] * (1.0 / float(n_total))


def focal_loss(logits, target, weight=None, *, tm: int = 512):
    N, C = logits.shape
    if weight is None:
        weight = jnp.ones((C,), jnp.float32)

    # Tile size: multiple of 8, as large as reasonable while keeping the
    # double-buffered logits tile comfortably inside scoped VMEM (v7x-safe).
    itemsize = jnp.dtype(logits.dtype).itemsize
    vmem_rows = max(8, (8 * 1024 * 1024) // max(1, 2 * C * itemsize))
    TM = min(_round_up(N, 8), _round_up(tm, 8), (vmem_rows // 8) * 8)
    TM = max(TM, 8)
    Np = _round_up(N, TM)
    grid = Np // TM

    x = logits                                   # native dtype; cast inside kernel
    t2 = target.reshape(N, 1).astype(jnp.int32)
    if Np != N:
        x = jnp.pad(x, ((0, Np - N), (0, 0)))
        t2 = jnp.pad(t2, ((0, Np - N), (0, 0)))
    w2 = weight.reshape(1, C).astype(jnp.float32)

    kernel = functools.partial(focal_loss_kernel, n_total=N)

    out = pl.pallas_call(
        kernel,
        out_shape=jax.ShapeDtypeStruct((1, 1), jnp.float32),
        grid=(grid,),
        in_specs=[
            pl.BlockSpec((TM, C), lambda i: (i, 0)),   # logits tile, auto-pipelined
            pl.BlockSpec((TM, 1), lambda i: (i, 0)),   # targets tile
            pl.BlockSpec((1, C), lambda i: (0, 0)),    # class weights, grid-invariant
        ],
        out_specs=pl.BlockSpec((1, 1), lambda i: (0, 0)),  # resident scalar accumulator
        compiler_params=pltpu.CompilerParams(
            dimension_semantics=("arbitrary",),  # output accumulates across the N axis
        ),
    )(x, t2, w2)
    return out[0, 0]


def focal_loss_ref(logits, target, weight):
    # Pure-JAX reference of the PyTorch forward, for correctness checking.
    p = jax.nn.softmax(logits.astype(jnp.float32), axis=1)
    p = jnp.clip(p, EPS, 1.0 - EPS)
    lp = jnp.log(p)
    N = logits.shape[0]
    pt = p[jnp.arange(N), target]
    lpt = lp[jnp.arange(N), target]
    wt = weight[target]
    loss = -wt * lpt * (1.0 - pt) ** GAMMA
    return jnp.mean(loss)


if __name__ == "__main__":
    key = jax.random.PRNGKey(0)
    k1, k2, k3, k4 = jax.random.split(key, 4)

    # Case 1: small, single tile (matches the module's (N, C) logits / (N,) target).
    N, C = 8, 16
    logits = jax.random.normal(k1, (N, C), dtype=jnp.float32)
    target = jax.random.randint(k2, (N,), 0, C, dtype=jnp.int32)
    weight = jnp.linspace(0.5, 1.5, C, dtype=jnp.float32)

    out = focal_loss(logits, target, weight)
    jax.block_until_ready(out)
    ref = focal_loss_ref(logits, target, weight)
    assert jnp.allclose(out, ref, rtol=1e-5, atol=1e-6), (out, ref)

    # Case 2: multi-tile grid with a ragged last tile (exercises pipelining + masking).
    N2, C2 = 50, 16
    logits2 = jax.random.normal(k3, (N2, C2), dtype=jnp.float32)
    target2 = jax.random.randint(k4, (N2,), 0, C2, dtype=jnp.int32)
    weight2 = jnp.linspace(0.5, 1.5, C2, dtype=jnp.float32)

    out2 = focal_loss(logits2, target2, weight2, tm=16)
    jax.block_until_ready(out2)
    ref2 = focal_loss_ref(logits2, target2, weight2)
    assert jnp.allclose(out2, ref2, rtol=1e-5, atol=1e-6), (out2, ref2)

    print("KERNEL_OK")
</pallas_src>

<mosaic_0001>
module attributes {stable_mosaic.version = 11 : i64} {
  func.func @focal_loss_kernel(%arg0: i32, %arg1: memref<8x16xf32, #tpu.memory_space<vmem>>, %arg2: memref<8x1xi32, #tpu.memory_space<vmem>>, %arg3: memref<1x16xf32, #tpu.memory_space<vmem>>, %arg4: memref<1x1xf32, #tpu.memory_space<vmem>>) attributes {dimension_semantics = [#tpu.dimension_semantics<arbitrary>], iteration_bounds = array<i64: 1>, scalar_prefetch = 0 : i64, scratch_operands = 0 : i64, tpu.core_type = #tpu.core_type<tc>, window_params = [{transform_indices = @transform_0, window_bounds = array<i64: 8, 16>}, {transform_indices = @transform_1, window_bounds = array<i64: 8, 1>}, {pipeline_mode = #tpu.pipeline_mode<synchronous>, transform_indices = @transform_2, window_bounds = array<i64: 1, 16>}, {pipeline_mode = #tpu.pipeline_mode<synchronous>, transform_indices = @transform_3, window_bounds = array<i64: 1, 1>}]} {
    %c0_i32 = arith.constant 0 : i32
    %0 = arith.cmpi eq, %arg0, %c0_i32 : i32
    %1 = arith.extui %0 : i1 to i32
    %c0_i32_0 = arith.constant 0 : i32
    %2 = arith.cmpi ne, %1, %c0_i32_0 : i32
    scf.if %2 {
      %cst_24 = arith.constant 0.000000e+00 : f32
      %58 = vector.broadcast %cst_24 : f32 to vector<1x1xf32>
      %c0_25 = arith.constant 0 : index
      %c0_26 = arith.constant 0 : index
      %59 = vector.load %arg4[%c0_25, %c0_26] : memref<1x1xf32, #tpu.memory_space<vmem>>, vector<1x1xf32>
      tpu.vector_store %arg4[%c0_25, %c0_26], %58 {strides = array<i32>} : memref<1x1xf32, #tpu.memory_space<vmem>>, vector<1x1xf32>,
    } else {
    }
    %c0 = arith.constant 0 : index
    %c0_1 = arith.constant 0 : index
    %3 = vector.load %arg1[%c0, %c0_1] : memref<8x16xf32, #tpu.memory_space<vmem>>, vector<8x16xf32>
    %c0_2 = arith.constant 0 : index
    %c0_3 = arith.constant 0 : index
    %4 = vector.load %arg2[%c0_2, %c0_3] : memref<8x1xi32, #tpu.memory_space<vmem>>, vector<8x1xi32>
    %c0_4 = arith.constant 0 : index
    %c0_5 = arith.constant 0 : index
    %5 = vector.load %arg3[%c0_4, %c0_5] : memref<1x16xf32, #tpu.memory_space<vmem>>, vector<1x16xf32>
    %cst = arith.constant dense<0xFF800000> : vector<8xf32>
    %6 = vector.multi_reduction <maximumf>, %3, %cst [1] : vector<8x16xf32> to vector<8xf32>
    %7 = vector.shape_cast %6 : vector<8xf32> to vector<8x1xf32>
    %8 = vector.broadcast %7 : vector<8x1xf32> to vector<8x16xf32>
    %9 = arith.subf %3, %8 : vector<8x16xf32>
    %10 = math.exp %9 : vector<8x16xf32>
    %cst_6 = arith.constant dense<0.000000e+00> : vector<8xf32>
    %11 = vector.multi_reduction <add>, %10, %cst_6 [1] : vector<8x16xf32> to vector<8xf32>
    %12 = vector.shape_cast %11 : vector<8xf32> to vector<8x1xf32>
    %13 = tpu.iota {dimensions = array<i32: 1>} : vector<8x16xi32>
    %14 = vector.broadcast %4 : vector<8x1xi32> to vector<8x16xi32>
    %15 = arith.cmpi eq, %13, %14 : vector<8x16xi32>
    %cst_7 = arith.constant 0.000000e+00 : f32
    %16 = vector.broadcast %cst_7 : f32 to vector<8x16xf32>
    %17 = arith.select %15, %10, %16 : vector<8x16xi1>, vector<8x16xf32>
    %cst_8 = arith.constant dense<0.000000e+00> : vector<8xf32>
    %18 = vector.multi_reduction <add>, %17, %cst_8 [1] : vector<8x16xf32> to vector<8xf32>
    %19 = vector.shape_cast %18 : vector<8xf32> to vector<8x1xf32>
    %cst_9 = arith.constant 0.000000e+00 : f32
    %20 = vector.shape_cast %5 : vector<1x16xf32> to vector<1x16xf32>
    %21 = vector.broadcast %20 : vector<1x16xf32> to vector<8x16xf32>
    %22 = vector.broadcast %cst_9 : f32 to vector<8x16xf32>
    %23 = arith.select %15, %21, %22 : vector<8x16xi1>, vector<8x16xf32>
    %cst_10 = arith.constant dense<0.000000e+00> : vector<8xf32>
    %24 = vector.multi_reduction <add>, %23, %cst_10 [1] : vector<8x16xf32> to vector<8xf32>
    %25 = vector.shape_cast %24 : vector<8xf32> to vector<8x1xf32>
    %26 = arith.divf %19, %12 : vector<8x1xf32>
    %cst_11 = arith.constant 1.000000e-07 : f32
    %cst_12 = arith.constant 0.99999988 : f32
    %27 = vector.broadcast %cst_11 : f32 to vector<8x1xf32>
    %28 = arith.maximumf %27, %26 : vector<8x1xf32>
    %29 = vector.broadcast %cst_12 : f32 to vector<8x1xf32>
    %30 = arith.minimumf %29, %28 : vector<8x1xf32>
    %31 = math.log %30 : vector<8x1xf32>
    %cst_13 = arith.constant 1.000000e+00 : f32
    %32 = vector.broadcast %cst_13 : f32 to vector<8x1xf32>
    %33 = arith.subf %32, %30 : vector<8x1xf32>
    %cst_14 = arith.constant 0.000000e+00 : f32
    %34 = vector.broadcast %cst_14 : f32 to vector<8x1xf32>
    %35 = arith.subf %34, %25 : vector<8x1xf32>
    %36 = arith.mulf %35, %31 : vector<8x1xf32>
    %37 = arith.mulf %33, %33 : vector<8x1xf32>
    %38 = arith.mulf %36, %37 : vector<8x1xf32>
    %c8_i32 = arith.constant 8 : i32
    %39 = arith.muli %arg0, %c8_i32 : i32
    %40 = tpu.iota {dimensions = array<i32: 0>} : vector<8x1xi32>
    %41 = vector.broadcast %39 : i32 to vector<8x1xi32>
    %42 = arith.addi %41, %40 : vector<8x1xi32>
    %c8_i32_15 = arith.constant 8 : i32
    %43 = vector.broadcast %c8_i32_15 : i32 to vector<8x1xi32>
    %44 = arith.cmpi slt, %42, %43 : vector<8x1xi32>
    %cst_16 = arith.constant 0.000000e+00 : f32
    %45 = vector.broadcast %cst_16 : f32 to vector<8x1xf32>
    %46 = arith.select %44, %38, %45 : vector<8x1xi1>, vector<8x1xf32>
    %c0_17 = arith.constant 0 : index
    %c0_18 = arith.constant 0 : index
    %47 = vector.load %arg4[%c0_17, %c0_18] : memref<1x1xf32, #tpu.memory_space<vmem>>, vector<1x1xf32>
    %48 = vector.shape_cast %46 : vector<8x1xf32> to vector<1x8x1xf32>
    %cst_19 = arith.constant dense<0.000000e+00> : vector<1xf32>
    %49 = vector.multi_reduction <add>, %48, %cst_19 [1, 2] : vector<1x8x1xf32> to vector<1xf32>
    %50 = vector.shape_cast %49 : vector<1xf32> to vector<1x1x1xf32>
    %51 = vector.extract %50[0, 0, 0] : f32 from vector<1x1x1xf32>
    %52 = vector.broadcast %51 : f32 to vector<1x1xf32>
    %53 = arith.addf %47, %52 : vector<1x1xf32>
    %c0_20 = arith.constant 0 : index
    %c0_21 = arith.constant 0 : index
    %54 = vector.load %arg4[%c0_20, %c0_21] : memref<1x1xf32, #tpu.memory_space<vmem>>, vector<1x1xf32>
    tpu.vector_store %arg4[%c0_20, %c0_21], %53 {strides = array<i32>} : memref<1x1xf32, #tpu.memory_space<vmem>>, vector<1x1xf32>,
    %c0_i32_22 = arith.constant 0 : i32
    %55 = arith.cmpi eq, %arg0, %c0_i32_22 : i32
    %56 = arith.extui %55 : i1 to i32
    %c0_i32_23 = arith.constant 0 : i32
    %57 = arith.cmpi ne, %56, %c0_i32_23 : i32
    scf.if %57 {
      %c0_24 = arith.constant 0 : index
      %c0_25 = arith.constant 0 : index
      %58 = vector.load %arg4[%c0_24, %c0_25] : memref<1x1xf32, #tpu.memory_space<vmem>>, vector<1x1xf32>
      %cst_26 = arith.constant 1.250000e-01 : f32
      %59 = vector.broadcast %cst_26 : f32 to vector<1x1xf32>
      %60 = arith.mulf %58, %59 : vector<1x1xf32>
      %c0_27 = arith.constant 0 : index
      %c0_28 = arith.constant 0 : index
      %61 = vector.load %arg4[%c0_27, %c0_28] : memref<1x1xf32, #tpu.memory_space<vmem>>, vector<1x1xf32>
      tpu.vector_store %arg4[%c0_27, %c0_28], %60 {strides = array<i32>} : memref<1x1xf32, #tpu.memory_space<vmem>>, vector<1x1xf32>,
    } else {
    }
    return
  }
  func.func @transform_0(%arg0: i32) -> (i32, i32) {
    %c0_i32 = arith.constant 0 : i32
    %c0_i32_0 = arith.constant 0 : i32
    return %arg0, %c0_i32 : i32, i32
  }
  func.func @transform_1(%arg0: i32) -> (i32, i32) {
    %c0_i32 = arith.constant 0 : i32
    %c0_i32_0 = arith.constant 0 : i32
    return %arg0, %c0_i32 : i32, i32
  }
  func.func @transform_2(%arg0: i32) -> (i32, i32) {
    %c0_i32 = arith.constant 0 : i32
    %c0_i32_0 = arith.constant 0 : i32
    %c0_i32_1 = arith.constant 0 : i32
    return %c0_i32, %c0_i32_0 : i32, i32
  }
  func.func @transform_3(%arg0: i32) -> (i32, i32) {
    %c0_i32 = arith.constant 0 : i32
    %c0_i32_0 = arith.constant 0 : i32
    %c0_i32_1 = arith.constant 0 : i32
    return %c0_i32, %c0_i32_0 : i32, i32
  }
}

</mosaic_0001>

<bundles_post_ra>
// kernel: tpu_custom_call.1
= control target key start
LH: loop header
LB: loop body
LE: loop exit
PB: predicated region body
PF: predicated region fallthrough
CT: control target
= control target key end

     0   :  { %vm24_vm0 = vcmask 130048   ;;  %s185_s0 = inlined_call_operand.vmem [shape: f32[8,16], index: 0, kind: input, shape index: {}]   ;;  %s186_s1 = inlined_call_operand.vmem [shape: s32[8,1], index: 1, kind: input, shape index: {}]   ;;  %s187_s2 = inlined_call_operand.vmem [shape: f32[1,16], index: 2, kind: input, shape index: {}]   ;;  %s188_s3 = inlined_call_operand.hbm [shape: f32[1,1], index: 3, kind: output, shape index: {}]  }
   0x1   :  { %v21_v0 = vld [vmem:[%s185_s0] sm:$0xff] }
   0x2   :  { %8 = vsyncpa [#allocation3], 0  ;;  %v25_v1 = vsel %vm24_vm0, %v21_v0, -inf  ;;  %v143_v2 = vmov 0   ;;  %v22_v3 = vld [vmem:[%s186_s1] sm:$0xff]  ;;  %v34_v7 = vlaneseq  ;;  %vm73_vm2 = vcmask 7168  }
   0x3   :  { %114 = vset.pattern.permute.xlu0 %v143_v2  ;;  %v108_v12 = vld [vmem:[%s187_s2] ss:$0 sm:$0xff]  ;;  %vm19_vm3 = vcmask 0   ;;  %v144_v32 = vmov 0.0   ;;  %s145_s2 = smov [#allocation2]  }
   0x4   :  { %26 = vmax.xlane.f32.xlu0 %v25_v1  ;;  %v35_v8 = vand.u32 127, %v34_v7  ;;  %20 = vst.msk [vmem:[#allocation2] sm:$0x1] %vm19_vm3, %v144_v32  ;;  %s100_s17 = sshll.u32 %s145_s2, 4  ;;  %s101_s17 = int_to_ptr.vmem [resolvable:$true] %s100_s17 }
   0x5   :  { %s121_s18 = scalar_lea.vmem %s101_s17, 16  ;;  %s125_s19 = scalar_lea.vmem %s101_s17, 32 }
   0x6   :  { %p122_p0 = scmp.ne.s32.totalorder %s101_s17, %s121_s18  ;;  %p126_p1 = scmp.lt.s32.totalorder %s101_s17, %s101_s17 }
   0x7   :  { %p127_p2 = scmp.lt.s32.totalorder %s125_s19, %s121_s18 }
   0x9   :  { %p128_p3 = por %p127_p2, %p126_p1 }
   0xb   :  { %v72_v40 = vld [vmem:[#allocation2] sm:$0x1]  ;;  %p129_p4 = pnand %p128_p3, %p122_p0 }
  0x1a   :  { %37 = vperm.xlu0 %114, %v22_v3  }
  0x8d   :  { %v27_v4 = vpop.xlane.xlu0 %26 }
  0x8e   :  { %v28_v5 = vsub.f32 %v21_v0, %v27_v4 }
  0x90   :  { %v29_v6 = vmul.f32 1.442695, %v28_v5 }
  0x92   :  { %115 = vpow2.f32 %v29_v6 }
  0x95   :  { %v38_v9 = vpop.permute.xlu0 %37 }
  0x96   :  { %vm39_vm1 = vcmp.eq.s32.totalorder %v35_v8, %v38_v9 }
  0x97   :  { %v50_v14 = vsel %vm39_vm1, %v108_v12, 0.0 }
  0x98   :  { %v51_v16 = vsel %vm24_vm0, %v50_v14, 0.0 }
  0x9f   :  { %v116_v10 = vpop.eup %115 }
  0xa0   :  { %v31_v11 = vsel %vm24_vm0, %v116_v10, 0.0  ;;  %v40_v13 = vsel %vm39_vm1, %v116_v10, 0.0 }
  0xa1   :  { %32 = vadd.xlane.f32.xlu1 %v31_v11  ;;  %v41_v15 = vsel %vm24_vm0, %v40_v13, 0.0 }
  0xa5   :  { %42 = vadd.xlane.f32.xlu1 %v41_v15 }
  0xa9   :  { %52 = vadd.xlane.f32.xlu1 %v51_v16 }
 0x12a   :  { %v33_v17 = vpop.xlane.xlu1 %32 }
 0x12b   :  { %117 = vrcp.f32 %v33_v17 }
 0x12e   :  { %v43_v19 = vpop.xlane.xlu1 %42 }
 0x132   :  { %v53_v23 = vpop.xlane.xlu1 %52 }
 0x133   :  { %v61_v27 = vsub.f32 0.0, %v53_v23 }
 0x138   :  { %v118_v18 = vpop.eup %117 }
 0x139   :  { %v55_v20 = vmul.f32 %v118_v18, %v43_v19 }
 0x13b   :  { %v56_v21 = vmax.f32 %v55_v20, 1e-07 }
 0x13d   :  { %v57_v22 = vmin.f32 %v56_v21, 0.9999999 }
 0x13f   :  { %119 = vlog2.f32 %v57_v22  ;;  %v60_v24 = vsub.f32 1.0, %v57_v22 }
 0x141   :  { %v63_v28 = vmul.f32 %v60_v24, %v60_v24 }
 0x14c   :  { %v120_v25 = vpop.eup %119 }
 0x14d   :  { %v59_v26 = vmul.f32 0.6931472, %v120_v25 }
 0x14f   :  { %v62_v29 = vmul.f32 %v61_v27, %v59_v26 }
 0x151   :  { %v64_v30 = vmul.f32 %v63_v28, %v62_v29 }
 0x153   :  { %v74_v31 = vsel %vm73_vm2, %v64_v30, 0.0 }
 0x154   :  { %75 = vadd.xlane.f32.xlu1 %v74_v31 }
 0x1dd   :  { %v76_v33 = vpop.xlane.xlu1 %75 }
 0x1de   :  { %v77_v34 = vrot.slane %v76_v33, 4 }
 0x1e0   :  { %v78_v35 = vadd.f32 %v77_v34, %v76_v33 }
 0x1e2   :  { %v79_v36 = vrot.slane %v78_v35, 2 }
 0x1e4   :  { %v80_v37 = vadd.f32 %v79_v36, %v78_v35 }
 0x1e6   :  { %v81_v38 = vrot.slane %v80_v37, 1 }
 0x1e8   :  { %v82_v39 = vadd.f32 %v81_v38, %v80_v37 }
 0x1ea   :  { %109 = vpush %v82_v39 }
 0x21b   :  { %s110_s1 = spop %109 }
 0x21c   :  { %v84_v41 = vstv %s110_s1 }
 0x21d   :  { %v85_v42 = vadd.f32 %v84_v41, %v72_v40 }
 0x21f   :  { %87 = vst.msk [vmem:[#allocation2] sm:$0x1] %vm19_vm3, %v85_v42 }
 0x226   :  { %v91_v43 = vld [vmem:[#allocation2] sm:$0x1] }
 0x227   :  { %v92_v44 = vmul.f32 0.125, %v91_v43 }
 0x229   :  { %93 = vst.msk [vmem:[#allocation2] sm:$0x1] %vm19_vm3, %v92_v44 }
 0x22a   :  { %132 = shalt.err (!%p129_p4)
}
 0x22b   :  { %103 = dma.vmem_to_hbm [thread:$0]  %s101_s17, 16, %s188_s3, [#allocation3]  }
 0x22c   :  { %141 = dma.done.wait [#allocation3], 16  }
 0x22d   :  { %142 = vsyncadd [#allocation3], 4294967280 }
 0x22e   :  { %107 = vsyncpa [#allocation3], 1 }

</bundles_post_ra>
